<compile_context>
chip_gen: v5e
topology: v5e:2x2
jax: 0.10.0
libtpu: 0.0.40
codegen_flags: <defaults>
</compile_context>

<pallas_src>
import functools

import jax
import jax.numpy as jnp
from jax.experimental import pallas as pl
from jax.experimental.pallas import tpu as pltpu

_MiB = 1024 * 1024


def _sigmoid(s):
    # sigmoid(s) = 1 / (1 + exp(-s)): exp runs on the EUP; reciprocal is exact
    # (approx=True would be cheaper but costs a few ULPs of accuracy).
    return pl.reciprocal(1.0 + jnp.exp(-s), approx=False)


def _excite(pooled, w1t_ref, b1_ref, w2t_ref, b2_ref):
    """pooled: (Bt, C) f32 -> gates (Bt, C) f32. Linear -> ReLU -> Linear -> Sigmoid."""
    h = jnp.dot(pooled, w1t_ref[...], preferred_element_type=jnp.float32) + b1_ref[...]
    h = jnp.maximum(h, 0.0)
    s = jnp.dot(h, w2t_ref[...], preferred_element_type=jnp.float32) + b2_ref[...]
    return _sigmoid(s)


# ---------------------------------------------------------------------------
# Path 1: fused kernel. One grid step = Bt batch elements; x is read from HBM
# exactly once and reused for both the squeeze (pool) and the rescale.
# ---------------------------------------------------------------------------
def _se_fused_kernel(x_ref, w1t_ref, b1_ref, w2t_ref, b2_ref, o_ref):
    x = x_ref[...]                                                  # (Bt, C, L)
    pooled = jnp.mean(jnp.abs(x).astype(jnp.float32), axis=-1)      # (Bt, C)
    gate = _excite(pooled, w1t_ref, b1_ref, w2t_ref, b2_ref)        # (Bt, C)
    o_ref[...] = (x.astype(jnp.float32) * gate[:, :, None]).astype(o_ref.dtype)


# ---------------------------------------------------------------------------
# Path 2: two-phase, L-tiled (used when a (1, C, L) slab would blow the VMEM
# block budget, e.g. large C*L on v7x's 64 MiB VMEM).
# ---------------------------------------------------------------------------
def _se_pool_mlp_kernel(x_ref, w1t_ref, b1_ref, w2t_ref, b2_ref,
                        g_ref, acc_ref, *, inv_l):
    li = pl.program_id(0)

    @pl.when(li == 0)
    def _():
        acc_ref[...] = jnp.zeros_like(acc_ref)

    # accumulate sum(|x|) over the current L tile, in f32
    acc_ref[...] += jnp.sum(jnp.abs(x_ref[...]).astype(jnp.float32), axis=-1)

    @pl.when(li == pl.num_programs(0) - 1)
    def _():
        pooled = acc_ref[...] * inv_l                               # mean over L
        g_ref[...] = _excite(pooled, w1t_ref, b1_ref, w2t_ref, b2_ref)


def _se_scale_kernel(x_ref, g_ref, o_ref):
    # x_ref: (Rt, Lt) lane-dense tile of x viewed as (B*C, L); g_ref: (Rt, 1)
    o_ref[...] = (x_ref[...].astype(jnp.float32) * g_ref[...]).astype(o_ref.dtype)


# ---------------------------------------------------------------------------
# Wrapper
# ---------------------------------------------------------------------------
def _pick_tile(n, multiple, target):
    """Largest divisor of n that is a multiple of `multiple` and <= max(target, multiple).
    Falls back to n (full extent, always legal) if no such divisor exists."""
    cap = max(target, multiple)
    best = None
    d = multiple
    while d <= min(n, cap):
        if n % d == 0:
            best = d
        d += multiple
    return best if best is not None else n


def _compiler_params(sem, est_bytes):
    # explicit scoped-VMEM limit; conservative cap for v7x's 64 MiB physical VMEM
    limit = int(max(32 * _MiB, min(64 * _MiB, 2 * est_bytes)))
    return pltpu.CompilerParams(dimension_semantics=sem, vmem_limit_bytes=limit)


def se_forward(x, w1, b1, w2, b2, *, block_budget_bytes=2 * _MiB):
    """SE forward pass.

    x: (B, C, L); w1: (H1, C), b1: (H1,), w2: (H2, H1), b2: (H2,) with H2 == C.
    """
    B, C, L = x.shape
    H1 = w1.shape[0]
    H2 = w2.shape[0]
    assert H2 == C, "hidden_size_2 must equal channel count for the final rescale"

    itemsize = jnp.dtype(x.dtype).itemsize
    # PyTorch Linear: y = x @ W^T + b  -> pre-transpose weights, lift biases to 2-D
    w1t = jnp.transpose(w1).astype(jnp.float32)     # (C, H1)
    w2t = jnp.transpose(w2).astype(jnp.float32)     # (H1, C)
    b1_2d = b1.reshape(1, H1).astype(jnp.float32)
    b2_2d = b2.reshape(1, H2).astype(jnp.float32)
    w_bytes = 4 * (C * H1 + H1 + H1 * H2 + H2)

    per_batch_bytes = C * L * itemsize

    if per_batch_bytes <= block_budget_bytes:
        # -------------------- fused path --------------------
        bt = max(1, min(B, block_budget_bytes // per_batch_bytes))
        if B >= 2:
            # keep at least 2 grid steps along the parallel axis (v7x: 2 TCs)
            bt = min(bt, max(1, B // 2))
        while B % bt != 0:
            bt -= 1
        est = 4 * bt * per_batch_bytes + 2 * w_bytes   # double-buffered in+out+weights
        return pl.pallas_call(
            _se_fused_kernel,
            out_shape=jax.ShapeDtypeStruct((B, C, L), x.dtype),
            grid=(B // bt,),
            in_specs=[
                pl.BlockSpec((bt, C, L), lambda b: (b, 0, 0)),
                pl.BlockSpec((C, H1), lambda b: (0, 0)),
                pl.BlockSpec((1, H1), lambda b: (0, 0)),
                pl.BlockSpec((H1, H2), lambda b: (0, 0)),
                pl.BlockSpec((1, H2), lambda b: (0, 0)),
            ],
            out_specs=pl.BlockSpec((bt, C, L), lambda b: (b, 0, 0)),
            compiler_params=_compiler_params(("parallel",), est),
        )(x, w1t, b1_2d, w2t, b2_2d)

    # -------------------- tiled two-phase path --------------------
    # TODO(synk): if L is large but not a multiple of 128, pad L in the wrapper so
    # it can still be tiled; currently such shapes fall back to a full-L block.

    # Phase A: accumulate |x| over L tiles, then run the MLP once on (B, C).
    lt_a = _pick_tile(L, 128, max(128, block_budget_bytes // max(1, B * C * itemsize)))
    est_a = 4 * B * C * lt_a * itemsize + 2 * w_bytes + 3 * B * C * 4
    gates = pl.pallas_call(
        functools.partial(_se_pool_mlp_kernel, inv_l=1.0 / float(L)),
        out_shape=jax.ShapeDtypeStruct((B, C), jnp.float32),
        grid=(L // lt_a,),
        in_specs=[
            pl.BlockSpec((B, C, lt_a), lambda l: (0, 0, l)),
            pl.BlockSpec((C, H1), lambda l: (0, 0)),
            pl.BlockSpec((1, H1), lambda l: (0, 0)),
            pl.BlockSpec((H1, H2), lambda l: (0, 0)),
            pl.BlockSpec((1, H2), lambda l: (0, 0)),
        ],
        out_specs=pl.BlockSpec((B, C), lambda l: (0, 0)),
        scratch_shapes=[pltpu.VMEM((B, C), jnp.float32)],
        compiler_params=_compiler_params(("arbitrary",), est_a),
    )(x, w1t, b1_2d, w2t, b2_2d)

    # Phase B: lane-dense rescale on x viewed as (B*C, L).
    R = B * C
    x2 = x.reshape(R, L)
    g2 = gates.reshape(R, 1)
    lt_b = _pick_tile(L, 128, max(128, block_budget_bytes // max(1, 8 * itemsize)))
    rt = _pick_tile(R, 8, max(8, block_budget_bytes // max(1, lt_b * itemsize)))
    est_b = 4 * rt * lt_b * itemsize + 2 * rt * 4
    out2 = pl.pallas_call(
        _se_scale_kernel,
        out_shape=jax.ShapeDtypeStruct((R, L), x.dtype),
        grid=(R // rt, L // lt_b),
        in_specs=[
            pl.BlockSpec((rt, lt_b), lambda r, l: (r, l)),
            pl.BlockSpec((rt, 1), lambda r, l: (r, 0)),
        ],
        out_specs=pl.BlockSpec((rt, lt_b), lambda r, l: (r, l)),
        compiler_params=_compiler_params(("parallel", "parallel"), est_b),
    )(x2, g2)
    return out2.reshape(B, C, L)


def se_reference(x, w1, b1, w2, b2):
    """Pure-JAX reference mirroring the PyTorch forward."""
    pooled = jnp.mean(jnp.abs(x), axis=-1, keepdims=True)       # (B, C, 1)
    out = jnp.swapaxes(pooled, -1, -2)                          # (B, 1, C)
    out = out @ w1.T + b1                                       # (B, 1, H1)
    out = jnp.maximum(out, 0.0)
    out = out @ w2.T + b2                                       # (B, 1, H2)
    out = jax.nn.sigmoid(out)
    out = jnp.swapaxes(out, -1, -2)                             # (B, H2, 1)
    return x * out


if __name__ == "__main__":
    key = jax.random.PRNGKey(0)

    def make_inputs(k, B, C, L, H1):
        kx, kw1, kb1, kw2, kb2 = jax.random.split(k, 5)
        x = jax.random.normal(kx, (B, C, L), dtype=jnp.float32)
        w1 = jax.random.normal(kw1, (H1, C), dtype=jnp.float32) * 0.1
        b1 = jax.random.normal(kb1, (H1,), dtype=jnp.float32) * 0.1
        w2 = jax.random.normal(kw2, (C, H1), dtype=jnp.float32) * 0.1
        b2 = jax.random.normal(kb2, (C,), dtype=jnp.float32) * 0.1
        return x, w1, b1, w2, b2

    k1, k2 = jax.random.split(key)

    # 1) Fused path: SE(input_size=8, hidden_size_1=32, hidden_size_2=8),
    #    x = (B=4, C=8, L=16). Batch-tiled: Bt=2 per step, 2 parallel grid steps.
    x, w1, b1, w2, b2 = make_inputs(k1, B=4, C=8, L=16, H1=32)
    out = jax.block_until_ready(se_forward(x, w1, b1, w2, b2))
    ref = se_reference(x, w1, b1, w2, b2)
    assert out.shape == x.shape
    assert jnp.allclose(out, ref, atol=1e-5, rtol=1e-5)

    # 2) L-tiled two-phase path (forced with a tiny block budget): exercises the
    #    accumulate-then-apply structure used when C*L would not fit VMEM (v7x).
    x2, w1b, b1b, w2b, b2b = make_inputs(k2, B=2, C=8, L=256, H1=32)
    out2 = jax.block_until_ready(
        se_forward(x2, w1b, b1b, w2b, b2b, block_budget_bytes=4096))
    ref2 = se_reference(x2, w1b, b1b, w2b, b2b)
    assert out2.shape == x2.shape
    assert jnp.allclose(out2, ref2, atol=1e-5, rtol=1e-5)

    print("KERNEL_OK")
</pallas_src>

<mosaic_0001>
module attributes {stable_mosaic.version = 11 : i64} {
  func.func @_se_fused_kernel(%arg0: i32, %arg1: memref<2x8x16xf32, #tpu.memory_space<vmem>>, %arg2: memref<8x32xf32, #tpu.memory_space<vmem>>, %arg3: memref<1x32xf32, #tpu.memory_space<vmem>>, %arg4: memref<32x8xf32, #tpu.memory_space<vmem>>, %arg5: memref<1x8xf32, #tpu.memory_space<vmem>>, %arg6: memref<2x8x16xf32, #tpu.memory_space<vmem>>) attributes {dimension_semantics = [#tpu.dimension_semantics<parallel>], iteration_bounds = array<i64: 2>, scalar_prefetch = 0 : i64, scratch_operands = 0 : i64, tpu.core_type = #tpu.core_type<tc>, window_params = [{transform_indices = @transform_0, window_bounds = array<i64: 2, 8, 16>}, {pipeline_mode = #tpu.pipeline_mode<synchronous>, transform_indices = @transform_1, window_bounds = array<i64: 8, 32>}, {pipeline_mode = #tpu.pipeline_mode<synchronous>, transform_indices = @transform_2, window_bounds = array<i64: 1, 32>}, {pipeline_mode = #tpu.pipeline_mode<synchronous>, transform_indices = @transform_3, window_bounds = array<i64: 32, 8>}, {pipeline_mode = #tpu.pipeline_mode<synchronous>, transform_indices = @transform_4, window_bounds = array<i64: 1, 8>}, {transform_indices = @transform_5, window_bounds = array<i64: 2, 8, 16>}]} {
    %c0 = arith.constant 0 : index
    %c0_0 = arith.constant 0 : index
    %c0_1 = arith.constant 0 : index
    %0 = vector.load %arg1[%c0, %c0_0, %c0_1] : memref<2x8x16xf32, #tpu.memory_space<vmem>>, vector<2x8x16xf32>
    %1 = math.absf %0 : vector<2x8x16xf32>
    %cst = arith.constant dense<0.000000e+00> : vector<2x8xf32>
    %2 = vector.multi_reduction <add>, %1, %cst [2] : vector<2x8x16xf32> to vector<2x8xf32>
    %cst_2 = arith.constant 1.600000e+01 : f32
    %3 = vector.broadcast %cst_2 : f32 to vector<2x8xf32>
    %4 = arith.divf %2, %3 : vector<2x8xf32>
    %c0_3 = arith.constant 0 : index
    %c0_4 = arith.constant 0 : index
    %5 = vector.load %arg2[%c0_3, %c0_4] : memref<8x32xf32, #tpu.memory_space<vmem>>, vector<8x32xf32>
    %cst_5 = arith.constant dense<0.000000e+00> : vector<2x32xf32>
    %6 = tpu.matmul %4, %5, %cst_5 {dimension_numbers = #tpu.dot_dimension_numbers<[1], [0], [0], [1], [0, 0, 1, 1], [], []>} : vector<2x8xf32>, vector<8x32xf32>, vector<2x32xf32> -> vector<2x32xf32>
    %c0_6 = arith.constant 0 : index
    %c0_7 = arith.constant 0 : index
    %7 = vector.load %arg3[%c0_6, %c0_7] : memref<1x32xf32, #tpu.memory_space<vmem>>, vector<1x32xf32>
    %8 = vector.broadcast %7 : vector<1x32xf32> to vector<2x32xf32>
    %9 = arith.addf %6, %8 : vector<2x32xf32>
    %cst_8 = arith.constant 0.000000e+00 : f32
    %10 = vector.broadcast %cst_8 : f32 to vector<2x32xf32>
    %11 = arith.maximumf %9, %10 : vector<2x32xf32>
    %c0_9 = arith.constant 0 : index
    %c0_10 = arith.constant 0 : index
    %12 = vector.load %arg4[%c0_9, %c0_10] : memref<32x8xf32, #tpu.memory_space<vmem>>, vector<32x8xf32>
    %cst_11 = arith.constant dense<0.000000e+00> : vector<2x8xf32>
    %13 = tpu.matmul %11, %12, %cst_11 {dimension_numbers = #tpu.dot_dimension_numbers<[1], [0], [0], [1], [0, 0, 1, 1], [], []>} : vector<2x32xf32>, vector<32x8xf32>, vector<2x8xf32> -> vector<2x8xf32>
    %c0_12 = arith.constant 0 : index
    %c0_13 = arith.constant 0 : index
    %14 = vector.load %arg5[%c0_12, %c0_13] : memref<1x8xf32, #tpu.memory_space<vmem>>, vector<1x8xf32>
    %15 = vector.broadcast %14 : vector<1x8xf32> to vector<2x8xf32>
    %16 = arith.addf %13, %15 : vector<2x8xf32>
    %cst_14 = arith.constant 0.000000e+00 : f32
    %17 = vector.broadcast %cst_14 : f32 to vector<2x8xf32>
    %18 = arith.subf %17, %16 : vector<2x8xf32>
    %19 = math.exp %18 : vector<2x8xf32>
    %cst_15 = arith.constant 1.000000e+00 : f32
    %20 = vector.broadcast %cst_15 : f32 to vector<2x8xf32>
    %21 = arith.addf %20, %19 : vector<2x8xf32>
    %22 = tpu.reciprocal %21 : vector<2x8xf32> -> vector<2x8xf32>
    %23 = vector.shape_cast %22 : vector<2x8xf32> to vector<2x8x1xf32>
    %24 = vector.broadcast %23 : vector<2x8x1xf32> to vector<2x8x16xf32>
    %25 = arith.mulf %0, %24 : vector<2x8x16xf32>
    %c0_16 = arith.constant 0 : index
    %c0_17 = arith.constant 0 : index
    %c0_18 = arith.constant 0 : index
    %26 = vector.load %arg6[%c0_16, %c0_17, %c0_18] : memref<2x8x16xf32, #tpu.memory_space<vmem>>, vector<2x8x16xf32>
    tpu.vector_store %arg6[%c0_16, %c0_17, %c0_18], %25 {strides = array<i32>} : memref<2x8x16xf32, #tpu.memory_space<vmem>>, vector<2x8x16xf32>,
    return
  }
  func.func @transform_0(%arg0: i32) -> (i32, i32, i32) {
    %c0_i32 = arith.constant 0 : i32
    %c0_i32_0 = arith.constant 0 : i32
    %c0_i32_1 = arith.constant 0 : i32
    return %arg0, %c0_i32, %c0_i32_0 : i32, i32, i32
  }
  func.func @transform_1(%arg0: i32) -> (i32, i32) {
    %c0_i32 = arith.constant 0 : i32
    %c0_i32_0 = arith.constant 0 : i32
    %c0_i32_1 = arith.constant 0 : i32
    return %c0_i32, %c0_i32_0 : i32, i32
  }
  func.func @transform_2(%arg0: i32) -> (i32, i32) {
    %c0_i32 = arith.constant 0 : i32
    %c0_i32_0 = arith.constant 0 : i32
    %c0_i32_1 = arith.constant 0 : i32
    return %c0_i32, %c0_i32_0 : i32, i32
  }
  func.func @transform_3(%arg0: i32) -> (i32, i32) {
    %c0_i32 = arith.constant 0 : i32
    %c0_i32_0 = arith.constant 0 : i32
    %c0_i32_1 = arith.constant 0 : i32
    return %c0_i32, %c0_i32_0 : i32, i32
  }
  func.func @transform_4(%arg0: i32) -> (i32, i32) {
    %c0_i32 = arith.constant 0 : i32
    %c0_i32_0 = arith.constant 0 : i32
    %c0_i32_1 = arith.constant 0 : i32
    return %c0_i32, %c0_i32_0 : i32, i32
  }
  func.func @transform_5(%arg0: i32) -> (i32, i32, i32) {
    %c0_i32 = arith.constant 0 : i32
    %c0_i32_0 = arith.constant 0 : i32
    %c0_i32_1 = arith.constant 0 : i32
    return %arg0, %c0_i32, %c0_i32_0 : i32, i32, i32
  }
}

</mosaic_0001>

<bundles_post_ra>
// kernel: tpu_custom_call.1
= control target key start
LH: loop header
LB: loop body
LE: loop exit
PB: predicated region body
PF: predicated region fallthrough
CT: control target
= control target key end

     0   :  { %10 = vsyncpa [#allocation3], 0  ;;  %s710_s0 = inlined_call_operand.vmem [shape: f32[4,8,16], index: 0, kind: input, shape index: {}]   ;;  %s711_s1 = inlined_call_operand.vmem [shape: f32[8,32], index: 1, kind: input, shape index: {}]   ;;  %s712_s2 = inlined_call_operand.vmem [shape: f32[1,32], index: 2, kind: input, shape index: {}]   ;;  %s713_s3 = inlined_call_operand.vmem [shape: f32[32,8], index: 3, kind: input, shape index: {}]   ;;  %s714_s4 = inlined_call_operand.vmem [shape: f32[1,8], index: 4, kind: input, shape index: {}]   ;;  %s715_s5 = inlined_call_operand.hbm [shape: f32[4,8,16], index: 5, kind: output, shape index: {}]  }
   0x1   :  { %12 = vsyncpa [#allocation3 + $0x1], 0  ;;  %s593_s18 = smov 0   ;;  %s595_s19 = smov 0  }
   0x2   :  { %s597_s20 = smov 0   ;;  %s599_s21 = smov 0  }
   0x3 LB: > { %s614_s22 = sadd.s32 4294967295, %s558_s21   ;;  %s429_s23 = sadd.s32 4294967294, %s558_s21   ;;  %s558_s21 = sphi %s599_s21, %s721_s21   ;;  %s554_s20 = sphi %s597_s20, %s720_s20   ;;  %s550_s19 = sphi %s595_s19, %s719_s19   ;;  %s546_s18 = sphi %s593_s18, %s718_s18  }
   0x4   : > { %s618_s24 = sadd.s32 1, %s558_s21   ;;  %s135_s25 = sadd.s32 1, %s554_s20 }
   0x5   : > { %s132_s26 = ssub.s32 %s558_s21, %s618_s24  ;;  %p145_p0 = scmp.ne.s32.totalorder %s554_s20, %s550_s19 }
   0x6   : > { %p133_p1 = scmp.eq.s32.totalorder %s132_s26, 0  ;;  %p146_p2 = scmp.eq.s32.totalorder %s614_s22, 1 }
   0x7   : > { %p151_p3 = scmp.ne.s32.totalorder %s550_s19, %s546_s18  ;;  %p152_p4 = scmp.eq.s32.totalorder %s429_s23, 1 }
   0x8   : > { %s629_s27 = scalar_select %p133_p1, %s554_s20, %s135_s25  }
   0x9   : > { %p631_p5 = por %p146_p2, %p145_p0  ;;  %p635_p6 = por %p152_p4, %p151_p3 }
   0xa   : > { %p432_p7 = scmp.ge.s32.totalorder %s558_s21, 1  ;;  %p191_p8 = scmp.lt.s32.totalorder %s558_s21, 3 }
   0xc   : > { %p192_p9 = pnand %p432_p7, %p191_p8 }
   0xd   : > { %s434_s30 = sshll.u32 (!%p192_p9), %s614_s22, 1  ;;  %s216_s8 = sand.u32 (!%p192_p9), 1, %s550_s19  }
   0xe   : > { %195 = sbr.rel (%p192_p9) target bundleno = 574 (0x23e), region = 40  ;;  %p220_p10 = scmp.lt.s32.totalorder (!%p192_p9), %s434_s30, 3 }
   0xf   : > { %s443_s10 = sshll.u32 (!%p192_p9), %s614_s22, 4  ;;  %s352_s22 = scalar_lea.sflag (!%p192_p9), [#allocation3], %s216_s8 }
  0x10   : > { %s363_s13 = scalar_lea.hbm (!%p192_p9), %s715_s5, %s443_s10 }
  0x11   : > { %s366_s16 = sshll.u32 (!%p192_p9), %s363_s13, 4  ;;  %s367_s16 = int_to_ptr.hbm [resolvable:$true] %s366_s16 }
  0x12   : > { %s510_s17 = sshra.s32 (!%p192_p9), %s367_s16, 4  ;;  %s511_s17 = int_to_ptr.hbm [resolvable:$true] %s510_s17 }
  0x13   : > { %s723_s30 = smov (!%p220_p10, %s434_s30), 3  ;;  %vm230_vm0 = vcmask 130048   ;;  %v560_v6 = vmov 16.0   ;;  %v246_v7 = vld [vmem:[%s711_s1] sm:$0xff]  ;;  %v286_v8 = vld [vmem:[%s713_s3 + $0x18] sm:$0xff]  ;;  %v253_v15 = vlaneseq  ;;  %vm257_vm2 = vcmask 1041409   ;;  %p517_p0 = scmp.lt.s32.totalorder %s511_s17, %s715_s5 }
  0x14   : > { %s435_s6 = sshll.u32 %s723_s30, 3  ;;  %490 = vrcp.f32 %v560_v6  ;;  %277 = vmatpush.msra.mxu0 %v246_v7  ;;  %307 = vmatpush.msra.mxu1 %v286_v8  ;;  %vm259_vm3 = vcmask 64512   ;;  %v285_v24 = vld [vmem:[%s713_s3 + $0x10] sm:$0xff]  ;;  %v284_v25 = vld [vmem:[%s713_s3 + $0x8] sm:$0xff]  ;;  %v283_v26 = vld [vmem:[%s713_s3] sm:$0xff]  ;;  %vm291_vm4 = vcmask 261120  }
  0x15   : > { %s223_s9 = scalar_lea.vmem %s710_s0, %s435_s6  ;;  %v254_v17 = vand.u32 127, %v253_v15  ;;  %v488_v27 = vld [vmem:[%s712_s2] ss:$0 sm:$0xff]  ;;  %v335_v31 = vshrl.u32 %v253_v15, 7  ;;  %s512_s23 = scalar_lea.hbm %s511_s17, 16 }
  0x16   : > { %v645_v0 = vld [vmem:[%s223_s9] sm:$0xff]  ;;  %v648_v2 = vld [vmem:[%s223_s9 + $0x8] sm:$0xff]  ;;  %308 = vmatpush.msra.mxu1 %v285_v24  ;;  %s433_s9 = sshll.u32 %s216_s8, 4  ;;  %p513_p11 = scmp.ne.s32.totalorder %s511_s17, %s512_s23 }
  0x17   : > { %v228_v1 = vand.u32 2147483647, %v645_v0  ;;  %v229_v4 = vand.u32 2147483647, %v648_v2  ;;  %486 = vset.pattern.permute.xlu1 %v335_v31  ;;  %487 = vset.pattern.permute.xlu0 %v335_v31  ;;  %v489_v32 = vld [vmem:[%s714_s4] ss:$0 sm:$0xff] }
  0x18   : > { %309 = vmatpush.msra.mxu1 %v284_v25  ;;  %s218_s14 = scalar_lea.vmem [#allocation2], %s433_s9  ;;  %p514_p12 = pnand %p513_p11, %p631_p5 }
  0x19   : > { %v231_v3 = vsel %vm230_vm0, %v228_v1, 0.0  ;;  %v234_v5 = vsel %vm230_vm0, %v229_v4, 0.0  ;;  %s364_s15 = sshll.u32 %s218_s14, 4  ;;  %s516_s30 = scalar_lea.hbm %s715_s5, 32  ;;  %s365_s15 = int_to_ptr.vmem [resolvable:$true] %s364_s15 }
  0x1a   : > { %232 = vadd.xlane.f32.xlu0 %v231_v3  ;;  %v491_v9 = vpop.eup %490  ;;  %310 = vmatpush.msra.mxu1 %v283_v26  ;;  %p515_p13 = pneg %p514_p12  ;;  %p518_p1 = scmp.lt.s32.totalorder %s516_s30, %s512_s23 }
  0x1b   : > { %v238_v10 = vmul.f32 16.0, %v491_v9  ;;  %vm242_vm1 = vweird.f32 %v491_v9 }
  0x1c   : > { %p519_p2 = por %p518_p1, %p517_p0 }
  0x1d   : > { %v239_v11 = vsub.f32 1.0, %v238_v10 }
  0x1e   : > { %p520_p3 = pnand %p519_p2, %p515_p13 }
  0x1f   : > { %v240_v12 = vmul.f32 %v491_v9, %v239_v11 }
  0x21   : > { %v241_v13 = vadd.f32 %v491_v9, %v240_v12 }
  0x22   : > { %235 = vadd.xlane.f32.xlu0 %v234_v5 }
  0x23   : > { %v243_v16 = vsel %vm242_vm1, %v491_v9, %v241_v13 }
  0x8d   : > { %v233_v14 = vpop.xlane.xlu0 %232 }
  0x8e   : > { %v244_v18 = vmul.f32 %v243_v16, %v233_v14 }
  0x90   : > { %v255_v21 = vperm.slane %v244_v18, %v254_v17 }
  0x95   : > { %v236_v19 = vpop.xlane.xlu0 %235 }
  0x96   : > { %v245_v20 = vmul.f32 %v243_v16, %v236_v19 }
  0x98   : > { %v256_v22 = vperm.slane %v245_v20, %v254_v17 }
  0x9a   : > { %v258_v23 = vsel %vm257_vm2, %v256_v22, %v255_v21 }
  0x9b   : > { %436 = vmatmul.msk.f32.vlgmr.msra.gmra.mxu0 %vm259_vm3, %v258_v23 }
 0x118   : > { %v279_v28 = vpop.f32.mrf.mxu0 }
 0x119   : > { %v280_v29 = vadd.f32 %v488_v27, %v279_v28 }
 0x11b   : > { %v282_v30 = vmax.f32 %v280_v29, 0.0 }
 0x11d   : > { %437 = vmatmul.msk.f32.vlgmr.msra.gmra.mxu1 %vm291_vm4, %v282_v30 }
 0x19a   : > { %v312_v33 = vpop.f32.mrf.mxu1 }
 0x19b   : > { %v313_v34 = vadd.f32 %v489_v32, %v312_v33 }
 0x19d   : > { %v315_v35 = vsub.f32 0.0, %v313_v34 }
 0x19f   : > { %v316_v36 = vmul.f32 1.442695, %v315_v35 }
 0x1a1   : > { %492 = vpow2.f32 %v316_v36 }
 0x1a7   : > { %v493_v37 = vpop.eup %492 }
 0x1a8   : > { %v318_v38 = vadd.f32 1.0, %v493_v37 }
 0x1aa   : > { %494 = vrcp.f32 %v318_v38  ;;  %v330_v42 = vand.u32 2147483648, %v318_v38  ;;  %v328_v44 = vand.u32 2147483647, %v318_v38  ;;  %vm324_vm6 = vweird.f32 %v318_v38 }
 0x1ac   : > { %v331_v46 = vor.u32 1.1754944e-38, %v330_v42  ;;  %vm329_vm8 = vcmp.eq.f32.partialorder %v328_v44, 8.507059e+37 }
 0x1b0   : > { %v495_v39 = vpop.eup %494 }
 0x1b1   : > { %v320_v40 = vmul.f32 %v495_v39, %v318_v38  ;;  %vm325_vm5 = vweird.f32 %v495_v39 }
 0x1b2   : > { %vm326_vm7 = vmor %vm324_vm6, %vm325_vm5 }
 0x1b3   : > { %v321_v41 = vsub.f32 1.0, %v320_v40 }
 0x1b5   : > { %v322_v43 = vmul.f32 %v495_v39, %v321_v41 }
 0x1b7   : > { %v323_v45 = vadd.f32 %v495_v39, %v322_v43 }
 0x1b9   : > { %v327_v47 = vsel %vm326_vm7, %v495_v39, %v323_v45 }
 0x1ba   : > { %v332_v48 = vsel %vm329_vm8, %v331_v46, %v327_v47 }
 0x1bb   : > { %v333_v49 = vperm.slane %v332_v48, 0  ;;  %v340_v50 = vperm.slane %v332_v48, 1 }
 0x1bd   : > { %338 = vperm.xlu1 %486, %v333_v49  }
 0x1c5   : > { %345 = vperm.xlu1 %486, %v340_v50  }
 0x22f   : > { %v339_v51 = vpop.permute.xlu1 %338 }
 0x230   : > { %v347_v52 = vmul.f32 %v339_v51, %v645_v0 }
 0x232   : > { %349 = vst.msk [vmem:[%s218_s14] sm:$0xff] %vm230_vm0, %v347_v52 }
 0x237   : > { %v346_v53 = vpop.permute.xlu1 %345 }
 0x238   : > { %v348_v54 = vmul.f32 %v346_v53, %v648_v2 }
 0x23a   : > { %350 = vst.msk [vmem:[%s218_s14 + $0x8] sm:$0xff] %vm230_vm0, %v348_v54 }
 0x23b   : > { %523 = shalt.err (!%p520_p3)
}
 0x23c   : > { %s561_s8 = smov 128   ;;  %s562_s9 = smov 8  }
 0x23d   : > { %444 = dma.vmem_to_hbm [thread:$0]  (%p631_p5), %s365_s15, 256, %s367_s16, %s352_s22, %s561_s8, %s561_s8, %s562_s9  }
 0x23e PF: > { %p450_p4 = scmp.ge.s32.totalorder %s558_s21, 2  ;;  %s381_s10 = sand.u32 1, %s546_s18  }
 0x23f   : > { %s382_s11 = scalar_lea.sflag [#allocation3], %s381_s10 }
 0x240   : > { %p447_p7 = pnand %p450_p4, %p635_p6 }
 0x242   : > { %p448_p8 = pneg %p447_p7 }
 0x244   : > { %541 = dma.done.wait (%p448_p8), %s382_s11, 256  }
 0x245   : > { %543 = vsyncadd (%p448_p8), %s382_s11, 4294967040  ;;  %p15_p9 = scmp.ge.s32.totalorder %s618_s24, 4   ;;  %s718_s18 = smov %s550_s19 }
 0x246   : > { %s719_s19 = smov %s554_s20  ;;  %s720_s20 = smov %s629_s27 }
 0x247   : > { %s721_s21 = smov %s618_s24  ;;  %17 = sbr.rel (!%p15_p9) target bundleno = 3 (0x3), region = 75 }
 0x24c   :  { %388 = vsyncpa [#allocation3], 1 }
 0x24d   :  { %390 = vsyncpa [#allocation3 + $0x1], 1 }

</bundles_post_ra>
